<compile_context>
chip_gen: v6e
topology: v6e:2x2x1
jax: 0.10.0
libtpu: 0.0.40
codegen_flags: <defaults>
</compile_context>

<pallas_src>
import jax
import jax.numpy as jnp
from jax.experimental import pallas as pl
from jax.experimental.pallas import tpu as pltpu


def flatten_head_kernel(x_ref, w_ref, b_ref, o_ref):
    """Fully fused Flatten_Head forward: one MXU matmul + bias.

    x_ref: (M, C*D)   with M = B*N  -- lane-dense LHS (C*D = 128 fills the MXU K)
    w_ref: (C*D, P*O) combined per-channel-linear x fc weight
    b_ref: (1, P*O)   combined bias
    o_ref: (M, P*O)
    """
    out = jnp.dot(x_ref[...], w_ref[...], preferred_element_type=jnp.float32)
    o_ref[...] = (out + b_ref[...]).astype(o_ref.dtype)


def combine_params(lin_w, lin_b, fc_w, fc_b):
    """Fold the C per-channel Linear(d_model->patch_len) layers and the
    fc(input_size->output_size) into one dense weight/bias pair.

    lin_w: [C, P, D], lin_b: [C, P], fc_w: [O, C], fc_b: [O]
    returns Wcomb (C*D, P*O), bcomb (1, P*O)
    """
    C, P, D = lin_w.shape
    O = fc_w.shape[0]
    w_comb = jnp.einsum("cpd,oc->cdpo", lin_w, fc_w).reshape(C * D, P * O)
    b_comb = (jnp.einsum("cp,oc->po", lin_b, fc_w) + fc_b[None, :]).reshape(1, P * O)
    return w_comb, b_comb


def flatten_head_forward(x, w_comb, b_comb, output_size):
    """Forward pass given the pre-combined parameters.

    x: [B, C, D, N]  (batch, input_size, d_model, num_patches)
    returns [B, N*P, O]
    """
    B, C, D, N = x.shape
    CD, PO = w_comb.shape
    O = output_size
    M = B * N

    # torch: x.permute(0,1,3,2) + per-channel slicing, expressed as a single
    # (B*N, C*D) lane-dense LHS.  This is the only non-kernel data-movement HLO
    # left on the hot path; it is forced by the [B, C, D, N] input contract.
    x2 = jnp.transpose(x, (0, 3, 1, 2)).reshape(M, CD)

    vmem = pl.BlockSpec(memory_space=pltpu.MemorySpace.VMEM)
    out_flat = pl.pallas_call(
        flatten_head_kernel,
        out_shape=jax.ShapeDtypeStruct((M, PO), x.dtype),
        in_specs=[vmem, vmem, vmem],
        out_specs=vmem,
    )(x2, w_comb, b_comb)

    # (B*N, P*O) -> (B, N*P, O): row-major, both reshapes are pure views
    # (output index l = n*P + p matches torch's view(B, C, N*P) + permute(0,2,1)).
    return out_flat.reshape(B, N * (PO // O), O)


def make_flatten_head(lin_w, lin_b, fc_w, fc_b):
    """Build the head once at parameter-load time.

    Wcomb/bcomb are computed here (one-off) and closed over by the jitted
    forward, so the per-call path is: relayout -> pallas_call -> view reshape.
    """
    O = fc_w.shape[0]
    w_comb, b_comb = combine_params(lin_w, lin_b, fc_w, fc_b)
    w_comb = jax.block_until_ready(w_comb)
    b_comb = jax.block_until_ready(b_comb)

    @jax.jit
    def forward(x):
        return flatten_head_forward(x, w_comb, b_comb, O)

    return forward


def reference_forward(x, lin_w, lin_b, fc_w, fc_b):
    """Pure-JAX reference matching the PyTorch semantics exactly."""
    B, C, D, N = x.shape
    P = lin_w.shape[1]
    xp = jnp.transpose(x, (0, 1, 3, 2))                                # [B, C, N, D]
    z = jnp.einsum("bcnd,cpd->bcnp", xp, lin_w) + lin_b[None, :, None, :]
    z = z.reshape(B, C, N * P)                                         # [B, C, L]
    z = jnp.transpose(z, (0, 2, 1))                                    # [B, L, C]
    return jnp.einsum("blc,oc->blo", z, fc_w) + fc_b[None, None, :]    # [B, L, O]


if __name__ == "__main__":
    # Small shapes consistent with the module:
    # batch=2, input_size(C)=4, d_model(D)=32, num_patches(N)=8,
    # patch_len(P)=16, output_size(O)=4
    B, C, D, N, P, O = 2, 4, 32, 8, 16, 4
    dtype = jnp.float32

    key = jax.random.PRNGKey(0)
    kx, kw, kb, kfw, kfb = jax.random.split(key, 5)

    x = jax.random.normal(kx, (B, C, D, N), dtype=dtype)

    # Deterministic synthetic parameters (shapes from the nn.Linear defs).
    lin_w = jax.random.normal(kw, (C, P, D), dtype=dtype) * (1.0 / jnp.sqrt(D))
    lin_b = jax.random.normal(kb, (C, P), dtype=dtype) * 0.01
    fc_w = jax.random.normal(kfw, (O, C), dtype=dtype) * (1.0 / jnp.sqrt(C))
    fc_b = jax.random.normal(kfb, (O,), dtype=dtype) * 0.01

    # One-off parameter combination (hoisted out of the per-forward path).
    fwd = make_flatten_head(lin_w, lin_b, fc_w, fc_b)

    out = jax.block_until_ready(fwd(x))

    ref = reference_forward(x, lin_w, lin_b, fc_w, fc_b)
    assert out.shape == (B, N * P, O), out.shape
    assert jnp.allclose(out, ref, atol=1e-4, rtol=1e-4), "mismatch vs reference"

    print("KERNEL_OK")
</pallas_src>

<mosaic_0001>
module attributes {stable_mosaic.version = 11 : i64} {
  func.func @flatten_head_kernel(%arg0: memref<16x128xf32, #tpu.memory_space<vmem>>, %arg1: memref<128x64xf32, #tpu.memory_space<vmem>>, %arg2: memref<1x64xf32, #tpu.memory_space<vmem>>, %arg3: memref<16x64xf32, #tpu.memory_space<vmem>>) attributes {dimension_semantics = [], scalar_prefetch = 0 : i64, scratch_operands = 0 : i64, tpu.core_type = #tpu.core_type<tc>} {
    %c0 = arith.constant 0 : index
    %c0_0 = arith.constant 0 : index
    %0 = vector.load %arg0[%c0, %c0_0] : memref<16x128xf32, #tpu.memory_space<vmem>>, vector<16x128xf32>
    %c0_1 = arith.constant 0 : index
    %c0_2 = arith.constant 0 : index
    %1 = vector.load %arg1[%c0_1, %c0_2] : memref<128x64xf32, #tpu.memory_space<vmem>>, vector<128x64xf32>
    %cst = arith.constant dense<0.000000e+00> : vector<16x64xf32>
    %2 = tpu.matmul %0, %1, %cst {dimension_numbers = #tpu.dot_dimension_numbers<[1], [0], [0], [1], [0, 0, 1, 1], [], []>} : vector<16x128xf32>, vector<128x64xf32>, vector<16x64xf32> -> vector<16x64xf32>
    %c0_3 = arith.constant 0 : index
    %c0_4 = arith.constant 0 : index
    %3 = vector.load %arg2[%c0_3, %c0_4] : memref<1x64xf32, #tpu.memory_space<vmem>>, vector<1x64xf32>
    %4 = vector.broadcast %3 : vector<1x64xf32> to vector<16x64xf32>
    %5 = arith.addf %2, %4 : vector<16x64xf32>
    %c0_5 = arith.constant 0 : index
    %c0_6 = arith.constant 0 : index
    %6 = vector.load %arg3[%c0_5, %c0_6] : memref<16x64xf32, #tpu.memory_space<vmem>>, vector<16x64xf32>
    tpu.vector_store %arg3[%c0_5, %c0_6], %5 {strides = array<i32>} : memref<16x64xf32, #tpu.memory_space<vmem>>, vector<16x64xf32>,
    return
  }
}

</mosaic_0001>

<bundles_post_ra>
// kernel: forward.1
= control target key start
LH: loop header
LB: loop body
LE: loop exit
PB: predicated region body
PF: predicated region fallthrough
CT: control target
= control target key end

     0   :  { %vm114_vm0 = vcmask 523264   ;;  %s258_s1 = inlined_call_operand.vmem [shape: f32[128,64], index: 1, kind: input, shape index: {}]   ;;  %s259_s0 = inlined_call_operand.vmem [shape: f32[16,128], index: 0, kind: input, shape index: {}]   ;;  %s260_s2 = inlined_call_operand.vmem [shape: f32[1,64], index: 2, kind: input, shape index: {}]   ;;  %s261_s3 = inlined_call_operand.vmem [shape: f32[16,64], index: 3, kind: output, shape index: {}]  }
   0x1   :  { %v31_v0 = vld [vmem:[%s258_s1 + $0x78] sm:$0xff]  ;;  %v30_v1 = vld [vmem:[%s258_s1 + $0x70] sm:$0xff]  ;;  %v29_v2 = vld [vmem:[%s258_s1 + $0x68] sm:$0xff] }
   0x2   :  { %140 = vmatprep.subr.mxu0 %v31_v0  ;;  %v28_v3 = vld [vmem:[%s258_s1 + $0x60] sm:$0xff]  ;;  %v27_v5 = vld [vmem:[%s258_s1 + $0x58] sm:$0xff]  ;;  %v26_v6 = vld [vmem:[%s258_s1 + $0x50] sm:$0xff] }
   0x3   :  { %141 = vmatpush3.msra.mxu0 %v31_v0  ;;  %v14_v4 = vld [vmem:[%s259_s0] sm:$0xff]  ;;  %v25_v7 = vld [vmem:[%s258_s1 + $0x48] sm:$0xff]  ;;  %v23_v9 = vld [vmem:[%s258_s1 + $0x38] sm:$0xff] }
   0x4   :  { %142 = vmatprep.subr.mxu0 %v30_v1  ;;  %172 = vmatprep.mubr.f32.mxu0 %v14_v4  ;;  %v24_v8 = vld [vmem:[%s258_s1 + $0x40] sm:$0xff]  ;;  %v22_v10 = vld [vmem:[%s258_s1 + $0x30] sm:$0xff]  ;;  %v21_v11 = vld [vmem:[%s258_s1 + $0x28] sm:$0xff] }
   0x5   :  { %143 = vmatpush3.msra.mxu0 %v30_v1  ;;  %v20_v12 = vld [vmem:[%s258_s1 + $0x20] sm:$0xff]  ;;  %v19_v13 = vld [vmem:[%s258_s1 + $0x18] sm:$0xff]  ;;  %v18_v14 = vld [vmem:[%s258_s1 + $0x10] sm:$0xff] }
   0x6   :  { %144 = vmatprep.subr.mxu0 %v29_v2  ;;  %v17_v15 = vld [vmem:[%s258_s1 + $0x8] sm:$0xff]  ;;  %v16_v16 = vld [vmem:[%s258_s1] sm:$0xff] }
   0x7   :  { %145 = vmatpush3.msra.mxu0 %v29_v2  ;;  %v15_v17 = vld [vmem:[%s259_s0 + $0x8] sm:$0xff]  ;;  %v121_v18 = vld [vmem:[%s260_s2] ss:$0 sm:$0xff] }
   0x8   :  { %146 = vmatprep.subr.mxu0 %v28_v3 }
   0x9   :  { %147 = vmatpush3.msra.mxu0 %v28_v3 }
   0xa   :  { %148 = vmatprep.subr.mxu0 %v27_v5 }
   0xb   :  { %149 = vmatpush3.msra.mxu0 %v27_v5 }
   0xc   :  { %150 = vmatprep.subr.mxu0 %v26_v6 }
   0xd   :  { %151 = vmatpush3.msra.mxu0 %v26_v6 }
   0xe   :  { %152 = vmatprep.subr.mxu0 %v25_v7 }
   0xf   :  { %153 = vmatpush3.msra.mxu0 %v25_v7 }
  0x10   :  { %154 = vmatprep.subr.mxu0 %v24_v8 }
  0x11   :  { %155 = vmatpush3.msra.mxu0 %v24_v8 }
  0x12   :  { %156 = vmatprep.subr.mxu0 %v23_v9 }
  0x13   :  { %157 = vmatpush3.msra.mxu0 %v23_v9 }
  0x14   :  { %158 = vmatprep.subr.mxu0 %v22_v10 }
  0x15   :  { %159 = vmatpush3.msra.mxu0 %v22_v10 }
  0x16   :  { %160 = vmatprep.subr.mxu0 %v21_v11 }
  0x17   :  { %161 = vmatpush3.msra.mxu0 %v21_v11 }
  0x18   :  { %162 = vmatprep.subr.mxu0 %v20_v12 }
  0x19   :  { %163 = vmatpush3.msra.mxu0 %v20_v12 }
  0x1a   :  { %164 = vmatprep.subr.mxu0 %v19_v13 }
  0x1b   :  { %165 = vmatpush3.msra.mxu0 %v19_v13 }
  0x1c   :  { %166 = vmatprep.subr.mxu0 %v18_v14 }
  0x1d   :  { %167 = vmatpush3.msra.mxu0 %v18_v14 }
  0x1e   :  { %168 = vmatprep.subr.mxu0 %v17_v15 }
  0x1f   :  { %169 = vmatpush3.msra.mxu0 %v17_v15 }
  0x20   :  { %170 = vmatprep.subr.mxu0 %v16_v16 }
  0x21   :  { %171 = vmatpush3.msra.mxu0 %v16_v16 }
  0x22   :  { %173 = vmatmul.mubr.f32.vlgmr.msra.gmra.mxu0 %v15_v17 }
  0xe2   :  { %v174_v19 = vpop.f32.mrf.mxu0 }
  0xe3   :  { %v111_v20 = vadd.f32 %v174_v19, %v121_v18 }
  0xe4   :  { %v105_v21 = vpop.f32.mrf.mxu0 }
  0xe5   :  { %116 = vst.msk [vmem:[%s261_s3 + $0x8] sm:$0xff] %vm114_vm0, %v111_v20  ;;  %v106_v22 = vadd.f32 %v121_v18, %v105_v21 }
  0xe7   :  { %115 = vst.msk [vmem:[%s261_s3] sm:$0xff] %vm114_vm0, %v106_v22 }

</bundles_post_ra>
